<compile_context>
chip_gen: v7x
topology: tpu7x:2x2x1
jax: 0.10.0
libtpu: 0.0.40
codegen_flags: <defaults>
</compile_context>

<pallas_src>
import functools

import jax
import jax.numpy as jnp
from jax import lax
from jax.experimental import pallas as pl
from jax.experimental.pallas import tpu as pltpu

LANE = 128
OUT_PAD = 8   # output rows padded to one f32 sublane tile


def _round_up(n, m):
    return ((n + m - 1) // m) * m


def _mlp_kernel(x_ref, w1_ref, b1_ref, w2_ref, b2_ref, w3_ref, b3_ref,
                w4t_ref, b4_ref, o_ref):
    """Fused 4-layer MLP on one [tb, in_size] f32 activation tile."""
    # TODO(synk): training-mode dropout(p=0.3) (pltpu.prng_random_bits mask) not
    #             implemented; eval-mode dropout is the identity, matching .eval().
    # fc1 + ReLU -- f32 matmul with K = in_size = 8 (one f32 sublane tile).
    h = jnp.dot(x_ref[...], w1_ref[...], preferred_element_type=jnp.float32)
    h = jnp.maximum(h + b1_ref[...], 0.0)
    # fc2 + ReLU (bf16 weights, f32 accumulate).
    h = jnp.dot(h.astype(jnp.bfloat16), w2_ref[...], preferred_element_type=jnp.float32)
    h = jnp.maximum(h + b2_ref[...], 0.0)
    # fc3 + ReLU.
    h = jnp.dot(h.astype(jnp.bfloat16), w3_ref[...], preferred_element_type=jnp.float32)
    h = jnp.maximum(h + b3_ref[...], 0.0)
    # Output layer, computed transposed ("NT" matmul, contracting the last dims):
    #   o_t[n, b] = sum_k w4t[n, k] * h[b, k]
    # so the store is a lane-dense (OUT_PAD, tb) block instead of a 128-wide slab.
    o_t = lax.dot_general(w4t_ref[...], h.astype(jnp.bfloat16),
                          dimension_numbers=(((1,), (1,)), ((), ())),
                          preferred_element_type=jnp.float32)
    o_ref[...] = o_t + b4_ref[...]          # b4: [OUT_PAD, 1] broadcasts over lanes


def _choose_batch_tile(B, tile_b):
    """Small batches: one 16-row-aligned tile. Large batches: >= 2 tiles of ~tile_b
    rows (128-row aligned) so v7x's two TensorCores both get work and batch-padding
    waste stays bounded."""
    if B <= tile_b:
        return max(16, _round_up(B, 16))
    n_tiles = max(2, -(-B // tile_b))
    return _round_up(-(-B // n_tiles), 128)


@functools.partial(jax.jit, static_argnames=("out_size", "tile_b"))
def mlp_forward(x, params, *, out_size=3, tile_b=1024):
    """x: [B, in_size] float32.  Returns [B, out_size] float32."""
    B, in_size = x.shape
    x = x.astype(jnp.float32)

    tb = _choose_batch_tile(B, tile_b)
    Bp = _round_up(B, tb)
    if Bp > B:                      # cheap row-only pad (32 B/row); no lane padding
        x = jnp.pad(x, ((0, Bp - B), (0, 0)))

    grid = (Bp // tb,)

    # Tiny weights/biases: same block every grid step -> loaded once, VMEM-resident.
    resident = lambda a: pl.BlockSpec(a.shape, lambda i: (0,) * a.ndim)

    hid = params["w2"].shape[0]     # padded hidden width (128)
    flops = 2 * Bp * (in_size * hid + hid * hid + hid * hid + hid * OUT_PAD)
    bytes_accessed = int(
        sum(int(p.size) * p.dtype.itemsize for p in params.values())
        + Bp * in_size * 4 + OUT_PAD * Bp * 4)

    out_t = pl.pallas_call(
        _mlp_kernel,
        out_shape=jax.ShapeDtypeStruct((OUT_PAD, Bp), jnp.float32),
        grid=grid,
        in_specs=[
            pl.BlockSpec((tb, in_size), lambda i: (i, 0)),
            resident(params["w1"]), resident(params["b1"]),
            resident(params["w2"]), resident(params["b2"]),
            resident(params["w3"]), resident(params["b3"]),
            resident(params["w4t"]), resident(params["b4"]),
        ],
        out_specs=pl.BlockSpec((OUT_PAD, tb), lambda i: (0, i)),
        compiler_params=pltpu.CompilerParams(
            dimension_semantics=("parallel",)),   # batch tiles across v7x's 2 TCs
        cost_estimate=pl.CostEstimate(
            flops=flops, transcendentals=0, bytes_accessed=bytes_accessed),
    )(x, params["w1"], params["b1"], params["w2"], params["b2"],
      params["w3"], params["b3"], params["w4t"], params["b4"])

    return out_t[:out_size, :B].T


def init_params(key, input_size=8, hidden_sizes=(64, 128, 64), output_size=3):
    """nn.Linear-style init (U[-1/sqrt(fan_in), +1/sqrt(fan_in)]).
    w1 is f32 [in_size, 128]; w2/w3 are bf16 [128, 128]; the output layer is stored
    transposed (PyTorch [out, in] layout) as bf16 w4t [8, 128] plus f32 b4 [8, 1] so
    the kernel can emit a lane-dense transposed output block.  Padding is zeros, so
    padded columns stay exactly 0 through every ReLU."""
    dims = [input_size, *hidden_sizes, output_size]
    params = {}

    def uniform(k, shape, fan_in):
        bound = 1.0 / float(fan_in) ** 0.5
        return jax.random.uniform(k, shape, jnp.float32, -bound, bound)

    # Hidden layers 1-3 stored [in, out].
    for i in range(3):
        fan_in, fan_out = dims[i], dims[i + 1]
        p_in = fan_in if i == 0 else _round_up(fan_in, LANE)
        p_out = _round_up(fan_out, LANE)
        key, kw, kb = jax.random.split(key, 3)
        w = uniform(kw, (fan_in, fan_out), fan_in)
        b = uniform(kb, (1, fan_out), fan_in)
        w_dtype = jnp.float32 if i == 0 else jnp.bfloat16
        params[f"w{i + 1}"] = (jnp.zeros((p_in, p_out), w_dtype)
                               .at[:fan_in, :fan_out].set(w.astype(w_dtype)))
        params[f"b{i + 1}"] = (jnp.zeros((1, p_out), jnp.float32)
                               .at[:, :fan_out].set(b))

    # Output layer, stored transposed: w4t[n, k] = W_out[n, k].
    fan_in, fan_out = dims[3], dims[4]
    key, kw, kb = jax.random.split(key, 3)
    w = uniform(kw, (fan_out, fan_in), fan_in)
    b = uniform(kb, (fan_out, 1), fan_in)
    params["w4t"] = (jnp.zeros((OUT_PAD, _round_up(fan_in, LANE)), jnp.bfloat16)
                     .at[:fan_out, :fan_in].set(w.astype(jnp.bfloat16)))
    params["b4"] = (jnp.zeros((OUT_PAD, 1), jnp.float32)
                    .at[:fan_out, :].set(b))
    return params


def mlp_reference(x, params, *, out_size=3):
    """Plain-JAX reference mirroring the kernel's f32-layer1 / bf16-weight math."""
    h = jnp.dot(x.astype(jnp.float32), params["w1"],
                preferred_element_type=jnp.float32)
    h = jnp.maximum(h + params["b1"], 0.0)
    for i in (2, 3):
        h = jnp.dot(h.astype(jnp.bfloat16), params[f"w{i}"],
                    preferred_element_type=jnp.float32)
        h = jnp.maximum(h + params[f"b{i}"], 0.0)
    o = jnp.dot(h.astype(jnp.bfloat16), params["w4t"].T,
                preferred_element_type=jnp.float32) + params["b4"].T
    return o[:, :out_size]


if __name__ == "__main__":
    key = jax.random.PRNGKey(0)
    k_params, k1, k2, k3 = jax.random.split(key, 4)

    input_size, hidden_sizes, output_size = 8, (64, 128, 64), 3
    params = init_params(k_params, input_size, hidden_sizes, output_size)

    # Small batch (single-tile latency path).
    x = jax.random.normal(k1, (8, input_size), jnp.float32)
    out = mlp_forward(x, params, out_size=output_size)
    jax.block_until_ready(out)
    ref = mlp_reference(x, params, out_size=output_size)
    assert out.shape == (8, output_size)
    assert jnp.allclose(out, ref, atol=1e-2, rtol=1e-2)

    # Non-multiple batch, single larger tile (row padding path).
    x2 = jax.random.normal(k2, (600, input_size), jnp.float32)
    out2 = mlp_forward(x2, params, out_size=output_size)
    jax.block_until_ready(out2)
    ref2 = mlp_reference(x2, params, out_size=output_size)
    assert out2.shape == (600, output_size)
    assert jnp.allclose(out2, ref2, atol=1e-2, rtol=1e-2)

    # Batch > tile_b: multi-tile grid (>= 2 steps; megacore / pipelined path).
    x3 = jax.random.normal(k3, (2500, input_size), jnp.float32)
    out3 = mlp_forward(x3, params, out_size=output_size)
    jax.block_until_ready(out3)
    ref3 = mlp_reference(x3, params, out_size=output_size)
    assert out3.shape == (2500, output_size)
    assert jnp.allclose(out3, ref3, atol=1e-2, rtol=1e-2)

    print("KERNEL_OK")
</pallas_src>

<mosaic_0001>
module attributes {stable_mosaic.version = 11 : i64} {
  func.func @_mlp_kernel(%arg0: i32, %arg1: memref<16x8xf32, #tpu.memory_space<vmem>>, %arg2: memref<8x128xf32, #tpu.memory_space<vmem>>, %arg3: memref<1x128xf32, #tpu.memory_space<vmem>>, %arg4: memref<128x128xbf16, #tpu.memory_space<vmem>>, %arg5: memref<1x128xf32, #tpu.memory_space<vmem>>, %arg6: memref<128x128xbf16, #tpu.memory_space<vmem>>, %arg7: memref<1x128xf32, #tpu.memory_space<vmem>>, %arg8: memref<8x128xbf16, #tpu.memory_space<vmem>>, %arg9: memref<8x1xf32, #tpu.memory_space<vmem>>, %arg10: memref<8x16xf32, #tpu.memory_space<vmem>>) attributes {dimension_semantics = [#tpu.dimension_semantics<parallel>], iteration_bounds = array<i64: 1>, scalar_prefetch = 0 : i64, scratch_operands = 0 : i64, tpu.core_type = #tpu.core_type<tc>, window_params = [{transform_indices = @transform_0, window_bounds = array<i64: 16, 8>}, {pipeline_mode = #tpu.pipeline_mode<synchronous>, transform_indices = @transform_1, window_bounds = array<i64: 8, 128>}, {pipeline_mode = #tpu.pipeline_mode<synchronous>, transform_indices = @transform_2, window_bounds = array<i64: 1, 128>}, {pipeline_mode = #tpu.pipeline_mode<synchronous>, transform_indices = @transform_3, window_bounds = array<i64: 128, 128>}, {pipeline_mode = #tpu.pipeline_mode<synchronous>, transform_indices = @transform_4, window_bounds = array<i64: 1, 128>}, {pipeline_mode = #tpu.pipeline_mode<synchronous>, transform_indices = @transform_5, window_bounds = array<i64: 128, 128>}, {pipeline_mode = #tpu.pipeline_mode<synchronous>, transform_indices = @transform_6, window_bounds = array<i64: 1, 128>}, {pipeline_mode = #tpu.pipeline_mode<synchronous>, transform_indices = @transform_7, window_bounds = array<i64: 8, 128>}, {pipeline_mode = #tpu.pipeline_mode<synchronous>, transform_indices = @transform_8, window_bounds = array<i64: 8, 1>}, {transform_indices = @transform_9, window_bounds = array<i64: 8, 16>}]} {
    %c0 = arith.constant 0 : index
    %c0_0 = arith.constant 0 : index
    %0 = vector.load %arg1[%c0, %c0_0] : memref<16x8xf32, #tpu.memory_space<vmem>>, vector<16x8xf32>
    %c0_1 = arith.constant 0 : index
    %c0_2 = arith.constant 0 : index
    %1 = vector.load %arg2[%c0_1, %c0_2] : memref<8x128xf32, #tpu.memory_space<vmem>>, vector<8x128xf32>
    %cst = arith.constant dense<0.000000e+00> : vector<16x128xf32>
    %2 = tpu.matmul %0, %1, %cst {dimension_numbers = #tpu.dot_dimension_numbers<[1], [0], [0], [1], [0, 0, 1, 1], [], []>} : vector<16x8xf32>, vector<8x128xf32>, vector<16x128xf32> -> vector<16x128xf32>
    %c0_3 = arith.constant 0 : index
    %c0_4 = arith.constant 0 : index
    %3 = vector.load %arg3[%c0_3, %c0_4] : memref<1x128xf32, #tpu.memory_space<vmem>>, vector<1x128xf32>
    %4 = vector.broadcast %3 : vector<1x128xf32> to vector<16x128xf32>
    %5 = arith.addf %2, %4 : vector<16x128xf32>
    %cst_5 = arith.constant 0.000000e+00 : f32
    %6 = vector.broadcast %cst_5 : f32 to vector<16x128xf32>
    %7 = arith.maximumf %5, %6 : vector<16x128xf32>
    %8 = arith.truncf %7 : vector<16x128xf32> to vector<16x128xbf16>
    %c0_6 = arith.constant 0 : index
    %c0_7 = arith.constant 0 : index
    %9 = vector.load %arg4[%c0_6, %c0_7] : memref<128x128xbf16, #tpu.memory_space<vmem>>, vector<128x128xbf16>
    %cst_8 = arith.constant dense<0.000000e+00> : vector<16x128xf32>
    %10 = tpu.matmul %8, %9, %cst_8 {dimension_numbers = #tpu.dot_dimension_numbers<[1], [0], [0], [1], [0, 0, 1, 1], [], []>} : vector<16x128xbf16>, vector<128x128xbf16>, vector<16x128xf32> -> vector<16x128xf32>
    %c0_9 = arith.constant 0 : index
    %c0_10 = arith.constant 0 : index
    %11 = vector.load %arg5[%c0_9, %c0_10] : memref<1x128xf32, #tpu.memory_space<vmem>>, vector<1x128xf32>
    %12 = vector.broadcast %11 : vector<1x128xf32> to vector<16x128xf32>
    %13 = arith.addf %10, %12 : vector<16x128xf32>
    %cst_11 = arith.constant 0.000000e+00 : f32
    %14 = vector.broadcast %cst_11 : f32 to vector<16x128xf32>
    %15 = arith.maximumf %13, %14 : vector<16x128xf32>
    %16 = arith.truncf %15 : vector<16x128xf32> to vector<16x128xbf16>
    %c0_12 = arith.constant 0 : index
    %c0_13 = arith.constant 0 : index
    %17 = vector.load %arg6[%c0_12, %c0_13] : memref<128x128xbf16, #tpu.memory_space<vmem>>, vector<128x128xbf16>
    %cst_14 = arith.constant dense<0.000000e+00> : vector<16x128xf32>
    %18 = tpu.matmul %16, %17, %cst_14 {dimension_numbers = #tpu.dot_dimension_numbers<[1], [0], [0], [1], [0, 0, 1, 1], [], []>} : vector<16x128xbf16>, vector<128x128xbf16>, vector<16x128xf32> -> vector<16x128xf32>
    %c0_15 = arith.constant 0 : index
    %c0_16 = arith.constant 0 : index
    %19 = vector.load %arg7[%c0_15, %c0_16] : memref<1x128xf32, #tpu.memory_space<vmem>>, vector<1x128xf32>
    %20 = vector.broadcast %19 : vector<1x128xf32> to vector<16x128xf32>
    %21 = arith.addf %18, %20 : vector<16x128xf32>
    %cst_17 = arith.constant 0.000000e+00 : f32
    %22 = vector.broadcast %cst_17 : f32 to vector<16x128xf32>
    %23 = arith.maximumf %21, %22 : vector<16x128xf32>
    %c0_18 = arith.constant 0 : index
    %c0_19 = arith.constant 0 : index
    %24 = vector.load %arg8[%c0_18, %c0_19] : memref<8x128xbf16, #tpu.memory_space<vmem>>, vector<8x128xbf16>
    %25 = arith.truncf %23 : vector<16x128xf32> to vector<16x128xbf16>
    %cst_20 = arith.constant dense<0.000000e+00> : vector<8x16xf32>
    %26 = tpu.matmul %24, %25, %cst_20 {dimension_numbers = #tpu.dot_dimension_numbers<[1], [1], [0], [0], [0, 0, 1, 0], [], []>} : vector<8x128xbf16>, vector<16x128xbf16>, vector<8x16xf32> -> vector<8x16xf32>
    %c0_21 = arith.constant 0 : index
    %c0_22 = arith.constant 0 : index
    %27 = vector.load %arg9[%c0_21, %c0_22] : memref<8x1xf32, #tpu.memory_space<vmem>>, vector<8x1xf32>
    %28 = vector.broadcast %27 : vector<8x1xf32> to vector<8x16xf32>
    %29 = arith.addf %26, %28 : vector<8x16xf32>
    %c0_23 = arith.constant 0 : index
    %c0_24 = arith.constant 0 : index
    %30 = vector.load %arg10[%c0_23, %c0_24] : memref<8x16xf32, #tpu.memory_space<vmem>>, vector<8x16xf32>
    tpu.vector_store %arg10[%c0_23, %c0_24], %29 {strides = array<i32>} : memref<8x16xf32, #tpu.memory_space<vmem>>, vector<8x16xf32>,
    return
  }
  func.func @transform_0(%arg0: i32) -> (i32, i32) {
    %c0_i32 = arith.constant 0 : i32
    %c0_i32_0 = arith.constant 0 : i32
    return %arg0, %c0_i32 : i32, i32
  }
  func.func @transform_1(%arg0: i32) -> (i32, i32) {
    %c0_i32 = arith.constant 0 : i32
    %c0_i32_0 = arith.constant 0 : i32
    %c0_i32_1 = arith.constant 0 : i32
    return %c0_i32, %c0_i32_0 : i32, i32
  }
  func.func @transform_2(%arg0: i32) -> (i32, i32) {
    %c0_i32 = arith.constant 0 : i32
    %c0_i32_0 = arith.constant 0 : i32
    %c0_i32_1 = arith.constant 0 : i32
    return %c0_i32, %c0_i32_0 : i32, i32
  }
  func.func @transform_3(%arg0: i32) -> (i32, i32) {
    %c0_i32 = arith.constant 0 : i32
    %c0_i32_0 = arith.constant 0 : i32
    %c0_i32_1 = arith.constant 0 : i32
    return %c0_i32, %c0_i32_0 : i32, i32
  }
  func.func @transform_4(%arg0: i32) -> (i32, i32) {
    %c0_i32 = arith.constant 0 : i32
    %c0_i32_0 = arith.constant 0 : i32
    %c0_i32_1 = arith.constant 0 : i32
    return %c0_i32, %c0_i32_0 : i32, i32
  }
  func.func @transform_5(%arg0: i32) -> (i32, i32) {
    %c0_i32 = arith.constant 0 : i32
    %c0_i32_0 = arith.constant 0 : i32
    %c0_i32_1 = arith.constant 0 : i32
    return %c0_i32, %c0_i32_0 : i32, i32
  }
  func.func @transform_6(%arg0: i32) -> (i32, i32) {
    %c0_i32 = arith.constant 0 : i32
    %c0_i32_0 = arith.constant 0 : i32
    %c0_i32_1 = arith.constant 0 : i32
    return %c0_i32, %c0_i32_0 : i32, i32
  }
  func.func @transform_7(%arg0: i32) -> (i32, i32) {
    %c0_i32 = arith.constant 0 : i32
    %c0_i32_0 = arith.constant 0 : i32
    %c0_i32_1 = arith.constant 0 : i32
    return %c0_i32, %c0_i32_0 : i32, i32
  }
  func.func @transform_8(%arg0: i32) -> (i32, i32) {
    %c0_i32 = arith.constant 0 : i32
    %c0_i32_0 = arith.constant 0 : i32
    %c0_i32_1 = arith.constant 0 : i32
    return %c0_i32, %c0_i32_0 : i32, i32
  }
  func.func @transform_9(%arg0: i32) -> (i32, i32) {
    %c0_i32 = arith.constant 0 : i32
    %c0_i32_0 = arith.constant 0 : i32
    return %c0_i32, %arg0 : i32, i32
  }
}

</mosaic_0001>

<bundles_post_ra>
// kernel: mlp_forward.1
= control target key start
LH: loop header
LB: loop body
LE: loop exit
PB: predicated region body
PF: predicated region fallthrough
CT: control target
= control target key end

     0   :  { %14 = vsyncpa [#allocation3], 0  ;;  %s739_s0 = inlined_call_operand.vmem [shape: f32[16,8], index: 0, kind: input, shape index: {}]   ;;  %s740_s1 = inlined_call_operand.vmem [shape: f32[8,128], index: 1, kind: input, shape index: {}]   ;;  %s741_s2 = inlined_call_operand.vmem [shape: f32[1,128], index: 2, kind: input, shape index: {}]   ;;  %s742_s3 = inlined_call_operand.hbm [shape: bf16[128,128], index: 3, kind: input, shape index: {}]   ;;  %s743_s4 = inlined_call_operand.vmem [shape: f32[1,128], index: 4, kind: input, shape index: {}]   ;;  %s744_s5 = inlined_call_operand.hbm [shape: bf16[128,128], index: 5, kind: input, shape index: {}]   ;;  %s745_s6 = inlined_call_operand.vmem [shape: f32[1,128], index: 6, kind: input, shape index: {}]   ;;  %s746_s7 = inlined_call_operand.vmem [shape: bf16[8,128], index: 7, kind: input, shape index: {}]   ;;  %s747_s8 = inlined_call_operand.vmem [shape: f32[8,1], index: 8, kind: input, shape index: {}]   ;;  %s748_s9 = inlined_call_operand.vmem [shape: f32[8,16], index: 9, kind: output, shape index: {}]  }
   0x1   :  { %15 = vsyncpa [#allocation5], 0  ;;  %s608_s30 = smov [#allocation2]   ;;  %s560_s13 = scalar_lea.hbm %s742_s3, 1024 }
   0x2   :  { %s27_s10 = sshll.u32 %s608_s30, 4  ;;  %p561_p0 = scmp.ne.s32.totalorder %s742_s3, %s560_s13  ;;  %s28_s10 = int_to_ptr.vmem [resolvable:$true] %s27_s10 }
   0x3   :  { %p564_p1 = scmp.lt.u32.totalorder %s560_s13, %s742_s3 }
   0x5   :  { %p566_p2 = pnand %p564_p1, %p561_p0 }
   0x7   :  { %569 = shalt.err (!%p566_p2)
}
   0x8   :  { %s570_s18 = scalar_lea.vmem %s28_s10, 1024  ;;  %p575_p4 = scmp.lt.s32.totalorder %s28_s10, %s28_s10 }
   0x9   :  { %p571_p3 = scmp.ne.s32.totalorder %s28_s10, %s570_s18  ;;  %p576_p5 = scmp.lt.s32.totalorder %s570_s18, %s570_s18 }
   0xb   :  { %p577_p6 = por %p576_p5, %p575_p4 }
   0xd   :  { %p578_p7 = pnand %p577_p6, %p571_p3 }
   0xf   :  { %581 = shalt.err (!%p578_p7)
}
  0x10   :  { %s609_s19 = smov 64   ;;  %s610_s20 = smov 4  }
  0x11   :  { %33 = dma.hbm_to_vmem [thread:$0]  %s742_s3, 1024, %s28_s10, [#allocation3], %s609_s19, %s609_s19, %s610_s20  }
  0x12   :  { %s611_s23 = smov [#allocation4]   ;;  %s582_s27 = scalar_lea.hbm %s744_s5, 1024 }
  0x13   :  { %s41_s24 = sshll.u32 %s611_s23, 4  ;;  %p583_p8 = scmp.ne.s32.totalorder %s744_s5, %s582_s27  ;;  %s42_s24 = int_to_ptr.vmem [resolvable:$true] %s41_s24 }
  0x14   :  { %p586_p9 = scmp.lt.u32.totalorder %s582_s27, %s744_s5 }
  0x16   :  { %p588_p10 = pnand %p586_p9, %p583_p8 }
  0x18   :  { %591 = shalt.err (!%p588_p10)
}
  0x19   :  { %s592_s12 = scalar_lea.vmem %s42_s24, 1024  ;;  %p597_p12 = scmp.lt.s32.totalorder %s42_s24, %s42_s24 }
  0x1a   :  { %p593_p11 = scmp.ne.s32.totalorder %s42_s24, %s592_s12  ;;  %p598_p13 = scmp.lt.s32.totalorder %s592_s12, %s592_s12 }
  0x1c   :  { %p599_p0 = por %p598_p13, %p597_p12 }
  0x1e   :  { %p600_p1 = pnand %p599_p0, %p593_p11 }
  0x20   :  { %603 = shalt.err (!%p600_p1)
}
  0x21   :  { %47 = dma.hbm_to_vmem [thread:$0]  %s744_s5, 1024, %s42_s24, [#allocation5], %s609_s19, %s609_s19, %s610_s20  }
  0x22   :  { %604 = dma.done.wait [#allocation3], 1024  }
  0x23   :  { %605 = vsyncadd [#allocation3], 4294966272 }
  0x24   :  { %606 = dma.done.wait [#allocation5], 1024  }
  0x25   :  { %607 = vsyncadd [#allocation5], 4294966272  ;;  %v612_v0 = vmov 0.0   ;;  %vm71_vm0 = vcmask 64512   ;;  %v63_v1 = vld [vmem:[%s740_s1] sm:$0xff]  ;;  %v62_v3 = vld [vmem:[%s739_s0 + $0x8] sm:$0xff] }
  0x26   :  { %490 = vmatprep.subr.bf16.mxu1 %v612_v0  ;;  %v61_v2 = vld [vmem:[%s739_s0] sm:$0xff]  ;;  %485 = vmatprep.subr.mxu0 %v63_v1  ;;  %v545_v5 = vld [vmem:[#allocation2 + $0x8] sm:$0xff]   ;;  %v546_v6 = vld [vmem:[#allocation2 + $0x10] sm:$0xff]   ;;  %vm613_vm1 = vmmov 0   ;;  %v614_v39 = vmov 0   ;;  %vm433_vm2 = vcmask 130048  }
  0x27   :  { %487 = vmatprep.mubr.msk.f32.mxu0 %vm71_vm0, %v61_v2  ;;  %v544_v4 = vld [vmem:[#allocation2] sm:$0xff]   ;;  %486 = vmatpush3.msra.mxu0 %v63_v1  ;;  %v547_v7 = vld [vmem:[#allocation2 + $0x18] sm:$0xff]   ;;  %v549_v9 = vld [vmem:[#allocation2 + $0x28] sm:$0xff]  }
  0x28   :  { %488 = vmatmul.mubr.msk.f32.vlgmr.msra.gmra.mrb[0].mxu0 %vm71_vm0, %v62_v3  ;;  %491 = vmatpush3.bf16.msra.mxu1 %v544_v4  ;;  %v548_v8 = vld [vmem:[#allocation2 + $0x20] sm:$0xff]   ;;  %v550_v10 = vld [vmem:[#allocation2 + $0x30] sm:$0xff]   ;;  %v551_v11 = vld [vmem:[#allocation2 + $0x38] sm:$0xff]  }
  0x29   :  { %492 = vmatprep.subr.bf16.mxu1 %v612_v0  ;;  %510 = vmatprep.subr.bf16.mxu0 %v612_v0  ;;  %v552_v12 = vld [vmem:[#allocation4] sm:$0xff]   ;;  %v553_v13 = vld [vmem:[#allocation4 + $0x8] sm:$0xff]   ;;  %v554_v14 = vld [vmem:[#allocation4 + $0x10] sm:$0xff]  }
  0x2a   :  { %506 = vmatprep.mubr.msk.bf16.mxu1 %vm613_vm1, %v612_v0  ;;  %526 = vmatprep.mubr.msk.bf16.mxu0 %vm613_vm1, %v612_v0  ;;  %v555_v15 = vld [vmem:[#allocation4 + $0x18] sm:$0xff]   ;;  %v556_v16 = vld [vmem:[#allocation4 + $0x20] sm:$0xff]   ;;  %v557_v17 = vld [vmem:[#allocation4 + $0x28] sm:$0xff]  }
  0x2b   :  { %511 = vmatpush3.bf16.msra.mxu0 %v552_v12  ;;  %v441_v18 = vld [vmem:[%s741_s2] ss:$0 sm:$0xff]  ;;  %v558_v26 = vld [vmem:[#allocation4 + $0x30] sm:$0xff]   ;;  %v559_v27 = vld [vmem:[#allocation4 + $0x38] sm:$0xff]   ;;  %543 = vset.pattern.permute.xlu0 %v614_v39 }
  0x2c   :  { %493 = vmatpush3.bf16.msra.mxu1 %v545_v5  ;;  %512 = vmatprep.subr.bf16.mxu0 %v612_v0  ;;  %v444_v28 = vld [vmem:[%s743_s4] ss:$0 sm:$0xff] }
  0x2d   :  { %494 = vmatprep.subr.bf16.mxu1 %v612_v0  ;;  %v387_v38 = vld [vmem:[%s747_s8] sm:$0xff] }
  0x2e   :  { %390 = vperm.xlu0 %543, %v387_v38   ;;  %v453_v40 = vld [vmem:[%s745_s6] ss:$0 sm:$0xff] }
  0x2f   :  { %513 = vmatpush3.bf16.msra.mxu0 %v553_v13  ;;  %v385_v50 = vld [vmem:[%s746_s7] sm:$0xf] }
  0x30   :  { %495 = vmatpush3.bf16.msra.mxu1 %v546_v6  ;;  %514 = vmatprep.subr.bf16.mxu0 %v612_v0 }
  0x31   :  { %496 = vmatprep.subr.bf16.mxu1 %v612_v0 }
  0x33   :  { %515 = vmatpush3.bf16.msra.mxu0 %v554_v14 }
  0x34   :  { %497 = vmatpush3.bf16.msra.mxu1 %v547_v7  ;;  %516 = vmatprep.subr.bf16.mxu0 %v612_v0 }
  0x35   :  { %498 = vmatprep.subr.bf16.mxu1 %v612_v0 }
  0x37   :  { %517 = vmatpush3.bf16.msra.mxu0 %v555_v15 }
  0x38   :  { %499 = vmatpush3.bf16.msra.mxu1 %v548_v8  ;;  %518 = vmatprep.subr.bf16.mxu0 %v612_v0 }
  0x39   :  { %500 = vmatprep.subr.bf16.mxu1 %v612_v0 }
  0x3b   :  { %519 = vmatpush3.bf16.msra.mxu0 %v556_v16 }
  0x3c   :  { %501 = vmatpush3.bf16.msra.mxu1 %v549_v9  ;;  %520 = vmatprep.subr.bf16.mxu0 %v612_v0 }
  0x3d   :  { %502 = vmatprep.subr.bf16.mxu1 %v612_v0 }
  0x3f   :  { %521 = vmatpush3.bf16.msra.mxu0 %v557_v17 }
  0x40   :  { %503 = vmatpush3.bf16.msra.mxu1 %v550_v10  ;;  %522 = vmatprep.subr.bf16.mxu0 %v612_v0 }
  0x41   :  { %504 = vmatprep.subr.bf16.mxu1 %v612_v0 }
  0x43   :  { %523 = vmatpush3.bf16.msra.mxu0 %v558_v26 }
  0x44   :  { %505 = vmatpush3.bf16.msra.mxu1 %v551_v11  ;;  %524 = vmatprep.subr.bf16.mxu0 %v612_v0 }
  0x45   :  { %530 = vmatprep.subr.bf16.mxu1 %v612_v0 }
  0x47   :  { %525 = vmatpush3.bf16.msra.mxu0 %v559_v27 }
  0xad   :  { %v391_v51 = vpop.permute.xlu0 %390 }
  0xfb   :  { %v489_v19 = vpop.f32.mrb[0].mxu0 }
  0xfc   :  { %v150_v20 = vadd.f32 %v489_v19, %v441_v18  ;;  %v144_v21 = vpop.f32.mrb[1].mxu0 }
  0xfd   :  { %v145_v22 = vadd.f32 %v441_v18, %v144_v21 }
  0xfe   :  { %v154_v23 = vmax.f32 %v150_v20, 0.0 }
  0xff   :  { %v153_v24 = vmax.f32 %v145_v22, 0.0 }
 0x101   :  { %v155_v25 = vpack.c.bf16 %v154_v23, %v153_v24 }
 0x103   :  { %507 = vmatmul.mubr.bf16.vlgmr.msra.gmra.mrb[0].mxu1 %v155_v25 }
 0x104   :  { %532 = vmatprep.mubr.msk.bf16.mxu1 %vm613_vm1, %v612_v0 }
 0x1d6   :  { %v261_v29 = vpop.f32.mrb[0].mxu1 }
 0x1d7   :  { %v262_v30 = vadd.f32 %v444_v28, %v261_v29  ;;  %v508_v31 = vpop.f32.mrb[1].mxu1 }
 0x1d8   :  { %v264_v32 = vpop.f32.mrb[2].mxu1 }
 0x1d9   :  { %v265_v33 = vadd.f32 %v444_v28, %v264_v32  ;;  %v509_v34 = vpop.f32.mrb[3].mxu1  ;;  %v268_v35 = vmax.f32 %v262_v30, 0.0 }
 0x1db   :  { %v269_v36 = vmax.f32 %v265_v33, 0.0 }
 0x1dd   :  { %v270_v37 = vpack.c.bf16 %v269_v36, %v268_v35 }
 0x1df   :  { %527 = vmatmul.mubr.bf16.vlgmr.msra.gmra.mrb[4].mxu0 %v270_v37 }
 0x2b2   :  { %v376_v41 = vpop.f32.mrb[4].mxu0 }
 0x2b3   :  { %v377_v42 = vadd.f32 %v453_v40, %v376_v41  ;;  %v528_v43 = vpop.f32.mrb[5].mxu0 }
 0x2b4   :  { %v379_v44 = vpop.f32.mrb[6].mxu0 }
 0x2b5   :  { %v380_v45 = vadd.f32 %v453_v40, %v379_v44  ;;  %v529_v46 = vpop.f32.mrb[7].mxu0  ;;  %v383_v47 = vmax.f32 %v377_v42, 0.0 }
 0x2b7   :  { %v384_v48 = vmax.f32 %v380_v45, 0.0 }
 0x2b9   :  { %v386_v49 = vpack.c.bf16 %v384_v48, %v383_v47 }
 0x2bb   :  { %531 = vmatpush3.bf16.xpose.msra.mxu1 %v386_v49 }
 0x2c2   :  { %533 = vmatmul.mubr.bf16.vlgmr.msra.gmra.mrb[4].mxu1 %v385_v50 }
 0x395   :  { %v427_v52 = vpop.f32.mrb[4].mxu1 }
 0x396   :  { %v428_v53 = vadd.f32 %v427_v52, %v391_v51  ;;  %v534_v54 = vpop.f32.mrb[5].mxu1 }
 0x397   :  { %v430_v55 = vpop.f32.mrb[6].mxu1 }
 0x398   :  { %434 = vst.msk [vmem:[%s748_s9] sm:$0xff] %vm433_vm2, %v428_v53  ;;  %v535_v56 = vpop.f32.mrb[7].mxu1 }
 0x399   :  { %439 = vsyncpa [#allocation3], 1 }
 0x39a   :  { %440 = vsyncpa [#allocation5], 1 }

</bundles_post_ra>
